<compile_context>
chip_gen: v7x
topology: tpu7x:2x2x1
jax: 0.10.0
libtpu: 0.0.40
codegen_flags: <defaults>
</compile_context>

<pallas_src>
import functools
import math

import jax
import jax.numpy as jnp
from jax.experimental import pallas as pl
from jax.experimental.pallas import tpu as pltpu


def _to_2tuple(v):
    return tuple(v) if isinstance(v, (tuple, list)) else (v, v)


def _adaptive_pad_kernel(x_ref, o_ref, *, pad_top, pad_bottom, pad_left,
                         pad_right):
    """Copy the input block into the padded output block.

    Interior rows are assembled as [zeros_left | x | zeros_right] and stored
    once with a full-width store starting at lane offset 0.  Only the top and
    bottom pad bands receive additional zero stores, so no element of the
    output is written twice.
    """
    _, c_tile, h, _ = x_ref.shape
    w_out = o_ref.shape[-1]
    dtype = o_ref.dtype

    x = x_ref[...]

    pieces = []
    if pad_left > 0:
        pieces.append(jnp.zeros((1, c_tile, h, pad_left), dtype))
    pieces.append(x)
    if pad_right > 0:
        pieces.append(jnp.zeros((1, c_tile, h, pad_right), dtype))
    rows = jnp.concatenate(pieces, axis=-1) if len(pieces) > 1 else x

    # Single full-width store of the H interior rows.
    o_ref[:, :, pad_top:pad_top + h, :] = rows

    # Zero only the remaining pad bands.
    if pad_top > 0:
        o_ref[:, :, 0:pad_top, :] = jnp.zeros((1, c_tile, pad_top, w_out),
                                              dtype)
    if pad_bottom > 0:
        o_ref[:, :, pad_top + h:, :] = jnp.zeros(
            (1, c_tile, pad_bottom, w_out), dtype)


class AdaptivePadding:
    """JAX/Pallas re-implementation of mmseg AdaptivePadding (NCHW)."""

    # Double-buffered (in + out) VMEM footprint budget per grid step.  Kept
    # conservative so it fits the default scoped VMEM on v5e/v6e (128 MiB
    # physical) and v7x (64 MiB physical, 32 MiB default scoped).
    _VMEM_TILE_BUDGET_BYTES = 8 * 1024 * 1024

    def __init__(self, kernel_size=1, stride=1, dilation=1, padding='corner'):
        assert padding in ('same', 'corner')
        self.kernel_size = _to_2tuple(kernel_size)
        self.stride = _to_2tuple(stride)
        self.dilation = _to_2tuple(dilation)
        self.padding = padding

    def get_pad_shape(self, input_shape):
        input_h, input_w = input_shape
        kernel_h, kernel_w = self.kernel_size
        stride_h, stride_w = self.stride
        output_h = math.ceil(input_h / stride_h)
        output_w = math.ceil(input_w / stride_w)
        pad_h = max((output_h - 1) * stride_h +
                    (kernel_h - 1) * self.dilation[0] + 1 - input_h, 0)
        pad_w = max((output_w - 1) * stride_w +
                    (kernel_w - 1) * self.dilation[1] + 1 - input_w, 0)
        return pad_h, pad_w

    def _pick_c_tile(self, n, c, h, w, h_out, w_out, itemsize):
        """Largest divisor of C that keeps the double-buffered tiles in VMEM,
        while keeping at least two grid steps when possible (v7x megacore)."""
        per_ch_bytes = (h * w + h_out * w_out) * itemsize
        max_c_tile = max(1, self._VMEM_TILE_BUDGET_BYTES // (2 * per_ch_bytes))
        c_tile = 1
        for d in range(1, c + 1):
            if c % d == 0 and d <= max_c_tile:
                c_tile = d
        if n * (c // c_tile) < 2 and c_tile > 1:
            for d in range(c_tile - 1, 0, -1):
                if c % d == 0:
                    c_tile = d
                    break
        return c_tile

    def __call__(self, x):
        # x: (N, C, H, W)
        n, c, h, w = x.shape
        pad_h, pad_w = self.get_pad_shape((h, w))
        if pad_h == 0 and pad_w == 0:
            return x

        if self.padding == 'corner':
            pad_top, pad_left = 0, 0
        else:  # 'same'
            pad_top, pad_left = pad_h // 2, pad_w // 2
        pad_bottom = pad_h - pad_top
        pad_right = pad_w - pad_left

        h_out = h + pad_h
        w_out = w + pad_w

        itemsize = jnp.dtype(x.dtype).itemsize
        c_tile = self._pick_c_tile(n, c, h, w, h_out, w_out, itemsize)

        kernel = functools.partial(
            _adaptive_pad_kernel,
            pad_top=pad_top, pad_bottom=pad_bottom,
            pad_left=pad_left, pad_right=pad_right)

        bytes_accessed = (n * c * h * w + n * c * h_out * w_out) * itemsize

        return pl.pallas_call(
            kernel,
            out_shape=jax.ShapeDtypeStruct((n, c, h_out, w_out), x.dtype),
            grid=(n, c // c_tile),
            in_specs=[
                pl.BlockSpec((1, c_tile, h, w), lambda i, j: (i, j, 0, 0)),
            ],
            out_specs=pl.BlockSpec((1, c_tile, h_out, w_out),
                                   lambda i, j: (i, j, 0, 0)),
            compiler_params=pltpu.CompilerParams(
                dimension_semantics=("parallel", "parallel")),
            cost_estimate=pl.CostEstimate(
                flops=0, transcendentals=0, bytes_accessed=bytes_accessed),
        )(x)


def _reference_pad(x, module: AdaptivePadding):
    """Pure-JAX reference of the forward pass (for self-check)."""
    h, w = x.shape[-2:]
    pad_h, pad_w = module.get_pad_shape((h, w))
    if pad_h == 0 and pad_w == 0:
        return x
    if module.padding == 'corner':
        pads = ((0, 0), (0, 0), (0, pad_h), (0, pad_w))
    else:
        pads = ((0, 0), (0, 0),
                (pad_h // 2, pad_h - pad_h // 2),
                (pad_w // 2, pad_w - pad_w // 2))
    return jnp.pad(x, pads)


if __name__ == "__main__":
    key = jax.random.PRNGKey(0)

    ok = True

    # Shapes mirror the docstring example: kernel=stride=16, input 15x17
    # -> padded to 16x32 ("corner" pads bottom-right, "same" pads around).
    x = jax.random.normal(key, (2, 4, 15, 17), dtype=jnp.float32)
    for mode in ("corner", "same"):
        adap = AdaptivePadding(kernel_size=16, stride=16, dilation=1,
                               padding=mode)
        out = jax.block_until_ready(adap(x))
        ref = _reference_pad(x, adap)
        if out.shape != (2, 4, 16, 32) or not jnp.allclose(out, ref):
            ok = False

    # Exercise pad_top > 0 ('same', even pad_h) and the C-tile split that
    # guarantees >= 2 grid steps when N == 1.
    x3 = jax.random.normal(key, (1, 6, 14, 17), dtype=jnp.float32)
    for mode in ("corner", "same"):
        adap = AdaptivePadding(kernel_size=16, stride=16, dilation=1,
                               padding=mode)
        out3 = jax.block_until_ready(adap(x3))
        ref3 = _reference_pad(x3, adap)
        if out3.shape != (1, 6, 16, 32) or not jnp.allclose(out3, ref3):
            ok = False

    # Also exercise the no-padding-needed early-exit path.
    x2 = jax.random.normal(key, (2, 4, 16, 32), dtype=jnp.float32)
    adap = AdaptivePadding(kernel_size=16, stride=16, dilation=1,
                           padding="corner")
    out2 = jax.block_until_ready(adap(x2))
    if out2.shape != x2.shape or not jnp.allclose(out2, x2):
        ok = False

    if ok:
        print("KERNEL_OK")
</pallas_src>

<mosaic_0001>
module attributes {stable_mosaic.version = 11 : i64} {
  func.func @_adaptive_pad_kernel(%arg0: i32, %arg1: i32, %arg2: memref<1x4x15x17xf32, #tpu.memory_space<vmem>>, %arg3: memref<1x4x16x32xf32, #tpu.memory_space<vmem>>) attributes {dimension_semantics = [#tpu.dimension_semantics<parallel>, #tpu.dimension_semantics<parallel>], iteration_bounds = array<i64: 2, 1>, scalar_prefetch = 0 : i64, scratch_operands = 0 : i64, tpu.core_type = #tpu.core_type<tc>, window_params = [{transform_indices = @transform_0, window_bounds = array<i64: 1, 4, 15, 17>}, {transform_indices = @transform_1, window_bounds = array<i64: 1, 4, 16, 32>}]} {
    %c0 = arith.constant 0 : index
    %c0_0 = arith.constant 0 : index
    %c0_1 = arith.constant 0 : index
    %c0_2 = arith.constant 0 : index
    %0 = vector.load %arg2[%c0, %c0_0, %c0_1, %c0_2] : memref<1x4x15x17xf32, #tpu.memory_space<vmem>>, vector<1x4x15x17xf32>
    %cst = arith.constant 0.000000e+00 : f32
    %1 = vector.broadcast %cst : f32 to vector<1x4x15x15xf32>
    %2 = tpu.concatenate %0, %1 in 3 : vector<1x4x15x17xf32>, vector<1x4x15x15xf32> -> vector<1x4x15x32xf32>
    %c0_3 = arith.constant 0 : index
    %c0_4 = arith.constant 0 : index
    %c0_5 = arith.constant 0 : index
    %c0_6 = arith.constant 0 : index
    %3 = vector.load %arg3[%c0_3, %c0_4, %c0_5, %c0_6] : memref<1x4x16x32xf32, #tpu.memory_space<vmem>>, vector<1x4x15x32xf32>
    tpu.vector_store %arg3[%c0_3, %c0_4, %c0_5, %c0_6], %2 {strides = array<i32>} : memref<1x4x16x32xf32, #tpu.memory_space<vmem>>, vector<1x4x15x32xf32>,
    %cst_7 = arith.constant 0.000000e+00 : f32
    %4 = vector.broadcast %cst_7 : f32 to vector<1x4x1x32xf32>
    %c0_8 = arith.constant 0 : index
    %c0_9 = arith.constant 0 : index
    %c15 = arith.constant 15 : index
    %c0_10 = arith.constant 0 : index
    %5 = vector.load %arg3[%c0_8, %c0_9, %c15, %c0_10] : memref<1x4x16x32xf32, #tpu.memory_space<vmem>>, vector<1x4x1x32xf32>
    tpu.vector_store %arg3[%c0_8, %c0_9, %c15, %c0_10], %4 {strides = array<i32>} : memref<1x4x16x32xf32, #tpu.memory_space<vmem>>, vector<1x4x1x32xf32>,
    return
  }
  func.func @transform_0(%arg0: i32, %arg1: i32) -> (i32, i32, i32, i32) {
    %c0_i32 = arith.constant 0 : i32
    %c0_i32_0 = arith.constant 0 : i32
    %c0_i32_1 = arith.constant 0 : i32
    return %arg0, %arg1, %c0_i32, %c0_i32_0 : i32, i32, i32, i32
  }
  func.func @transform_1(%arg0: i32, %arg1: i32) -> (i32, i32, i32, i32) {
    %c0_i32 = arith.constant 0 : i32
    %c0_i32_0 = arith.constant 0 : i32
    %c0_i32_1 = arith.constant 0 : i32
    return %arg0, %arg1, %c0_i32, %c0_i32_0 : i32, i32, i32, i32
  }
}

</mosaic_0001>

<bundles_post_ra>
// kernel: tpu_custom_call.1
= control target key start
LH: loop header
LB: loop body
LE: loop exit
PB: predicated region body
PF: predicated region fallthrough
CT: control target
= control target key end

     0   :  { %6 = vsyncpa [#allocation3], 0  ;;  %s597_s0 = inlined_call_operand.vmem [shape: f32[2,4,15,17], index: 0, kind: input, shape index: {}]   ;;  %s598_s1 = inlined_call_operand.hbm [shape: f32[2,4,16,32], index: 1, kind: output, shape index: {}]  }
   0x1   :  { %8 = vsyncpa [#allocation3 + $0x1], 0  ;;  %s447_s6 = smov 0   ;;  %s449_s7 = smov 0  }
   0x2   :  { %s451_s8 = smov 0   ;;  %s453_s9 = smov 0  }
   0x3   :  { %s455_s10 = smov 0   ;;  %s457_s11 = smov 0  }
   0x4 LB: > { %s280_s12 = sadd.s32 4294967295, %s431_s11   ;;  %s281_s13 = sadd.s32 4294967294, %s431_s11   ;;  %s431_s11 = sphi %s457_s11, %s14_s11   ;;  %s427_s10 = sphi %s455_s10, %s605_s10   ;;  %s423_s9 = sphi %s453_s9, %s604_s9   ;;  %s419_s8 = sphi %s451_s8, %s603_s8   ;;  %s415_s7 = sphi %s449_s7, %s602_s7   ;;  %s411_s6 = sphi %s447_s6, %s601_s6  }
   0x5   : > { %s26_s14 = sadd.s32 1, %s427_s10  ;;  %s63_s15 = sadd.s32 1, %s419_s8 }
   0x6   : > { %p28_p0 = scmp.ge.s32.totalorder %s26_s14, 2  ;;  %p73_p1 = scmp.ne.s32.totalorder %s419_s8, %s415_s7 }
   0x7   : > { %p74_p2 = scmp.eq.s32.totalorder %s280_s12, 1  ;;  %p79_p3 = scmp.ne.s32.totalorder %s415_s7, %s411_s6 }
   0x8   : > { %s607_s14 = smov (%p28_p0, %s26_s14), 0  ;;  %p80_p5 = scmp.eq.s32.totalorder %s281_s13, 1 }
   0x9   : > { %p487_p4 = por %p74_p2, %p73_p1  ;;  %s58_s17 = ssub.s32 %s427_s10, %s607_s14 }
   0xa   : > { %p284_p6 = scmp.ge.s32.totalorder %s431_s11, 1  ;;  %p61_p7 = scmp.eq.s32.totalorder %s58_s17, 0 }
   0xb   : > { %p494_p8 = por %p80_p5, %p79_p3  ;;  %p112_p9 = scmp.lt.s32.totalorder %s431_s11, 3 }
   0xc   : > { %s500_s19 = scalar_select %p61_p7, %s419_s8, %s63_s15  }
   0xd   : > { %p113_p10 = pnand %p284_p6, %p112_p9 }
   0xe   : > { %s134_s20 = sand.u32 (!%p113_p10), 1, %s415_s7   ;;  %p138_p11 = scmp.lt.s32.totalorder (!%p113_p10), %s423_s9, 1  ;;  %vm176_vm0 = vcmask (!%p113_p10), 253952   ;;  %v433_v0 = vmov (!%p113_p10), 0.0   ;;  %vm157_vm1 = vcmask (!%p113_p10), 138240   ;;  %vm166_vm2 = vcmask (!%p113_p10), 261120  }
   0xf   : > { %116 = sbr.rel (%p113_p10) target bundleno = 48 (0x30), region = 24  ;;  %s285_s21 = sshll.u32 (!%p113_p10), %s134_s20, 6  ;;  %vm168_vm3 = vcmask (!%p113_p10), 260096  }
  0x10   : > { %s507_s23 = scalar_lea.vmem (!%p113_p10), [#allocation2], %s285_s21  ;;  %s294_s25 = sshll.u32 (!%p113_p10), %s423_s9, 10 }
  0x11   : > { %177 = vst.msk [vmem:[%s507_s23 + $0xf] sm:$0x1] (!%p113_p10), %vm176_vm0, %v433_v0  ;;  %178 = vst.msk [vmem:[%s507_s23 + $0x1f] sm:$0x1] (!%p113_p10), %vm176_vm0, %v433_v0  ;;  %s198_s29 = sshll.u32 (!%p113_p10), %s507_s23, 4  ;;  %s532_s3 = scalar_lea.hbm (!%p113_p10), %s598_s1, %s294_s25  ;;  %s534_s29 = int_to_ptr.vmem [resolvable:$true] %s198_s29 }
  0x12   : > { %179 = vst.msk [vmem:[%s507_s23 + $0x2f] sm:$0x1] (!%p113_p10), %vm176_vm0, %v433_v0  ;;  %180 = vst.msk [vmem:[%s507_s23 + $0x3f] sm:$0x1] (!%p113_p10), %vm176_vm0, %v433_v0  ;;  %s551_s4 = scalar_lea.sflag (!%p113_p10), [#allocation3], %s134_s20  ;;  %s353_s5 = scalar_lea.vmem (!%p113_p10), %s534_s29, 1024 }
  0x13   : > { %p354_p12 = scmp.ne.s32.totalorder (!%p113_p10), %s534_s29, %s353_s5 }
  0x15   : > { %p355_p13 = pnand (!%p113_p10), %p354_p12, %p487_p4 }
  0x16   : > { %s139_s22 = scalar_select %p138_p11, %s423_s9, 1 }
  0x17   : > { %p356_p0 = pneg %p355_p13  ;;  %s434_s9 = smov [#allocation2]  }
  0x18   : > { %s293_s24 = sshll.u32 %s139_s22, 6  ;;  %s357_s12 = sshll.u32 %s434_s9, 4  ;;  %s358_s12 = int_to_ptr.vmem [resolvable:$false] %s357_s12 }
  0x19   : > { %s146_s28 = scalar_lea.vmem %s597_s0, %s293_s24  ;;  %s359_s13 = scalar_lea.vmem %s358_s12, 2048 }
  0x1a   : > { %v149_v1 = vld [vmem:[%s146_s28] sm:$0xff]  ;;  %v150_v2 = vld [vmem:[%s146_s28 + $0x8] sm:$0x7f]  ;;  %v151_v3 = vld [vmem:[%s146_s28 + $0x10] sm:$0xff]  ;;  %p360_p1 = scmp.lt.s32.totalorder %s534_s29, %s358_s12  ;;  %p361_p2 = scmp.lt.s32.totalorder %s359_s13, %s353_s5 }
  0x1b   : > { %v158_v4 = vsel %vm157_vm1, %v149_v1, 0.0  ;;  %v159_v5 = vsel %vm157_vm1, %v150_v2, 0.0  ;;  %v160_v6 = vsel %vm157_vm1, %v151_v3, 0.0  ;;  %v152_v7 = vld [vmem:[%s146_s28 + $0x18] sm:$0x7f]  ;;  %v153_v8 = vld [vmem:[%s146_s28 + $0x20] sm:$0xff] }
  0x1c   : > { %167 = vst.msk [vmem:[%s507_s23] sm:$0xff] %vm166_vm2, %v158_v4  ;;  %170 = vst.msk [vmem:[%s507_s23 + $0x10] sm:$0xff] %vm166_vm2, %v160_v6  ;;  %v161_v9 = vsel %vm157_vm1, %v152_v7, 0.0  ;;  %v162_v10 = vsel %vm157_vm1, %v153_v8, 0.0  ;;  %v154_v11 = vld [vmem:[%s146_s28 + $0x28] sm:$0x7f]  ;;  %p362_p3 = por %p361_p2, %p360_p1 }
  0x1d   : > { %169 = vst.msk [vmem:[%s507_s23 + $0x8] sm:$0x7f] %vm168_vm3, %v159_v5  ;;  %v155_v12 = vld [vmem:[%s146_s28 + $0x30] sm:$0xff]  ;;  %171 = vst.msk [vmem:[%s507_s23 + $0x18] sm:$0x7f] %vm168_vm3, %v161_v9  ;;  %v163_v13 = vsel %vm157_vm1, %v154_v11, 0.0 }
  0x1e   : > { %172 = vst.msk [vmem:[%s507_s23 + $0x20] sm:$0xff] %vm166_vm2, %v162_v10  ;;  %v164_v14 = vsel %vm157_vm1, %v155_v12, 0.0  ;;  %v156_v15 = vld [vmem:[%s146_s28 + $0x38] sm:$0x7f]  ;;  %p363_p5 = pnand %p362_p3, %p356_p0 }
  0x1f   : > { %173 = vst.msk [vmem:[%s507_s23 + $0x28] sm:$0x7f] %vm168_vm3, %v163_v13  ;;  %v165_v16 = vsel %vm157_vm1, %v156_v15, 0.0 }
  0x20   : > { %174 = vst.msk [vmem:[%s507_s23 + $0x30] sm:$0xff] %vm166_vm2, %v164_v14 }
  0x21   : > { %175 = vst.msk [vmem:[%s507_s23 + $0x38] sm:$0x7f] %vm168_vm3, %v165_v16 }
  0x22   : > { %366 = shalt.err (!%p363_p5)
}
  0x23   : > { %s367_s15 = scalar_lea.hbm %s532_s3, 1024  ;;  %s371_s21 = scalar_lea.hbm %s598_s1, 2048 }
  0x24   : > { %p368_p6 = scmp.ne.s32.totalorder %s532_s3, %s367_s15  ;;  %p372_p10 = scmp.lt.u32.totalorder %s532_s3, %s598_s1 }
  0x25   : > { %p373_p11 = scmp.lt.u32.totalorder %s371_s21, %s367_s15  ;;  %p375_p13 = scmp.lt.u32.totalorder %s367_s15, %s532_s3 }
  0x26   : > { %p369_p7 = pnand %p368_p6, %p487_p4 }
  0x27   : > { %p374_p12 = por %p373_p11, %p372_p10 }
  0x28   : > { %p370_p9 = pneg %p369_p7 }
  0x29   : > { %p376_p0 = por %p375_p13, %p374_p12 }
  0x2b   : > { %p377_p1 = pnand %p376_p0, %p370_p9 }
  0x2d   : > { %380 = shalt.err (!%p377_p1)
}
  0x2e   : > { %s435_s24 = smov 128   ;;  %s436_s25 = smov 8  }
  0x2f   : > { %295 = dma.vmem_to_hbm [thread:$0]  (%p487_p4), %s534_s29, 1024, %s532_s3, %s551_s4, %s435_s24, %s435_s24, %s436_s25  }
  0x30 PF: > { %p301_p2 = scmp.ge.s32.totalorder %s431_s11, 2  ;;  %s213_s26 = sand.u32 1, %s411_s6  }
  0x31   : > { %s214_s27 = scalar_lea.sflag [#allocation3], %s213_s26 }
  0x32   : > { %p298_p3 = pnand %p301_p2, %p494_p8 }
  0x34   : > { %406 = dma.done.wait (!%p298_p3), %s214_s27, 1024  }
  0x35   : > { %408 = vsyncadd (!%p298_p3), %s214_s27, 4294966272  ;;  %s14_s11 = sadd.s32 1, %s431_s11   ;;  %s601_s6 = smov %s415_s7 }
  0x36   : > { %p11_p5 = scmp.ge.s32.totalorder %s14_s11, 4   ;;  %s602_s7 = smov %s419_s8 }
  0x37   : > { %s603_s8 = smov %s500_s19  ;;  %s604_s9 = smov %s427_s10 }
  0x38   : > { %s605_s10 = smov %s607_s14  ;;  %13 = sbr.rel (!%p11_p5) target bundleno = 4 (0x4), region = 59 }
  0x3f   :  { %219 = vsyncpa [#allocation3], 1 }
  0x40   :  { %221 = vsyncpa [#allocation3 + $0x1], 1 }

</bundles_post_ra>
